<compile_context>
chip_gen: v5e
topology: v5e:2x2
jax: 0.10.0
libtpu: 0.0.40
codegen_flags: <defaults>
</compile_context>

<pallas_src>
import functools

import jax
import jax.numpy as jnp
from jax.experimental import pallas as pl
from jax.experimental.pallas import tpu as pltpu


def _round_up(x, m):
    return ((x + m - 1) // m) * m


def deep_linear_kernel(*refs):
    """refs = (x_ref, w0_ref, ..., wN_ref, o_ref).

    Chained matmuls on the MXU. Accumulation is f32 via
    preferred_element_type; one cast to the output dtype at the end.
    """
    x_ref = refs[0]
    w_refs = refs[1:-1]
    o_ref = refs[-1]

    acc = jnp.dot(x_ref[...], w_refs[0][...],
                  preferred_element_type=jnp.float32)
    for w_ref in w_refs[1:]:
        acc = jnp.dot(acc.astype(w_ref.dtype), w_ref[...],
                      preferred_element_type=jnp.float32)
    o_ref[...] = acc.astype(o_ref.dtype)


def deep_linear(x, weights, *, tm=128, collapse=False, interpret=False):
    """Forward of DeepLinear.

    collapse=True mirrors the PyTorch eval-path weight cache: pre-multiply the
    weight chain once (plain JAX, outside the kernel, done once per set of
    weights) and run a single-matmul kernel.
    """
    if collapse and len(weights) > 1:
        w = functools.reduce(
            lambda a, b: jnp.dot(a, b, preferred_element_type=jnp.float32),
            weights[1:], weights[0]).astype(weights[0].dtype)
        weights = [w]

    M, d_in = x.shape
    d_out = weights[-1].shape[1]
    out_dtype = x.dtype

    # Batch tile: multiple of 8 sublanes; don't over-tile tiny batches.
    tm = max(8, min(_round_up(tm, 8), _round_up(M, 8)))
    Mp = _round_up(M, tm)
    if Mp != M:
        x = jnp.pad(x, ((0, Mp - M), (0, 0)))
    grid = (Mp // tm,)

    in_specs = [pl.BlockSpec((tm, d_in), lambda i: (i, 0))]
    for w in weights:
        # Full-array block, same block every grid step (weights stay resident).
        in_specs.append(pl.BlockSpec(w.shape, lambda i: (0, 0)))
    out_spec = pl.BlockSpec((tm, d_out), lambda i: (i, 0))

    # Advisory cost estimate so XLA schedules the custom call sensibly.
    dims_chain = [d_in] + [w.shape[1] for w in weights]
    flops = 2 * Mp * sum(a * b for a, b in zip(dims_chain[:-1], dims_chain[1:]))
    w_bytes = sum(int(w.size) * w.dtype.itemsize for w in weights)
    bytes_accessed = (int(x.size) * x.dtype.itemsize + w_bytes
                      + Mp * d_out * jnp.dtype(out_dtype).itemsize)
    cost = pl.CostEstimate(flops=flops, transcendentals=0,
                           bytes_accessed=bytes_accessed)

    # VMEM budget: double-buffered x/out tiles + (double-buffered) weights +
    # largest f32 intermediate activation. Clamp to 56 MiB for v7x safety.
    vmem_needed = (2 * tm * d_in * jnp.dtype(x.dtype).itemsize
                   + 2 * tm * d_out * jnp.dtype(out_dtype).itemsize
                   + 2 * w_bytes
                   + tm * max(dims_chain) * 4)
    vmem_limit = int(min(56 * 1024 * 1024,
                         max(2 * vmem_needed, 32 * 1024 * 1024)))

    out = pl.pallas_call(
        deep_linear_kernel,
        out_shape=jax.ShapeDtypeStruct((Mp, d_out), out_dtype),
        grid_spec=pltpu.PrefetchScalarGridSpec(
            num_scalar_prefetch=0,
            grid=grid,
            in_specs=in_specs,
            out_specs=out_spec,
        ),
        compiler_params=pltpu.CompilerParams(
            dimension_semantics=("parallel",),
            vmem_limit_bytes=vmem_limit,
        ),
        cost_estimate=cost,
        interpret=interpret,
    )(x, *weights)

    return out[:M] if Mp != M else out


def init_deep_linear_params(key, dim_in, *dims, dtype=jnp.float32):
    """Mirror DeepLinear.__init__: one randn weight per (d_k, d_{k+1}) pair."""
    all_dims = [dim_in, *dims]
    pairs = list(zip(all_dims[:-1], all_dims[1:]))
    keys = jax.random.split(key, len(pairs))
    return [jax.random.normal(k, shape=p, dtype=dtype)
            for k, p in zip(keys, pairs)]


if __name__ == "__main__":
    # Lane-dense (128-multiple) dims keep MXU columns full and output stores
    # unmasked; batch=256 with tm=128 gives a 2-step "parallel" grid so both
    # v7x TensorCores get a tile.
    dim_in, dims = 128, (256, 128, 128)
    batch = 256

    root = jax.random.PRNGKey(0)
    kx, kw = jax.random.split(root)
    x = jax.random.normal(kx, (batch, dim_in), dtype=jnp.float32)
    weights = init_deep_linear_params(kw, dim_in, *dims, dtype=jnp.float32)

    # Pure-JAX reference = reduce(mm, weights, x) (training path of the module).
    y_ref = functools.reduce(
        lambda a, b: jnp.dot(a, b, preferred_element_type=jnp.float32),
        weights, x)
    scale = float(jnp.max(jnp.abs(y_ref))) + 1e-6

    def _check(y, ref, name):
        assert y.shape == ref.shape, f"{name}: shape {y.shape} vs {ref.shape}"
        err = float(jnp.max(jnp.abs(y - ref))) / scale
        assert err < 2e-2, f"{name}: relative error {err}"

    # Training path: chained matmuls inside the kernel.
    y_train = jax.block_until_ready(deep_linear(x, weights, tm=128))
    _check(y_train, y_ref, "train")

    # Eval path: weight chain collapsed once outside, single-matmul kernel
    # (mirrors the PyTorch self._cache).
    y_eval = jax.block_until_ready(deep_linear(x, weights, tm=128, collapse=True))
    _check(y_eval, y_ref, "eval")

    # Uneven batch exercises the padding path.
    y_odd = jax.block_until_ready(deep_linear(x[:200], weights, tm=128))
    _check(y_odd, y_ref[:200], "uneven-batch")

    print("KERNEL_OK")
</pallas_src>

<mosaic_0001>
module attributes {stable_mosaic.version = 11 : i64} {
  func.func @deep_linear_kernel(%arg0: i32, %arg1: memref<128x128xf32, #tpu.memory_space<vmem>>, %arg2: memref<128x256xf32, #tpu.memory_space<vmem>>, %arg3: memref<256x128xf32, #tpu.memory_space<vmem>>, %arg4: memref<128x128xf32, #tpu.memory_space<vmem>>, %arg5: memref<128x128xf32, #tpu.memory_space<vmem>>) attributes {dimension_semantics = [#tpu.dimension_semantics<parallel>], iteration_bounds = array<i64: 2>, scalar_prefetch = 0 : i64, scratch_operands = 0 : i64, tpu.core_type = #tpu.core_type<tc>, window_params = [{transform_indices = @transform_0, window_bounds = array<i64: 128, 128>}, {pipeline_mode = #tpu.pipeline_mode<synchronous>, transform_indices = @transform_1, window_bounds = array<i64: 128, 256>}, {pipeline_mode = #tpu.pipeline_mode<synchronous>, transform_indices = @transform_2, window_bounds = array<i64: 256, 128>}, {pipeline_mode = #tpu.pipeline_mode<synchronous>, transform_indices = @transform_3, window_bounds = array<i64: 128, 128>}, {transform_indices = @transform_4, window_bounds = array<i64: 128, 128>}]} {
    %c0 = arith.constant 0 : index
    %c0_0 = arith.constant 0 : index
    %0 = vector.load %arg1[%c0, %c0_0] : memref<128x128xf32, #tpu.memory_space<vmem>>, vector<128x128xf32>
    %c0_1 = arith.constant 0 : index
    %c0_2 = arith.constant 0 : index
    %1 = vector.load %arg2[%c0_1, %c0_2] : memref<128x256xf32, #tpu.memory_space<vmem>>, vector<128x256xf32>
    %cst = arith.constant dense<0.000000e+00> : vector<128x256xf32>
    %2 = tpu.matmul %0, %1, %cst {dimension_numbers = #tpu.dot_dimension_numbers<[1], [0], [0], [1], [0, 0, 1, 1], [], []>} : vector<128x128xf32>, vector<128x256xf32>, vector<128x256xf32> -> vector<128x256xf32>
    %c0_3 = arith.constant 0 : index
    %c0_4 = arith.constant 0 : index
    %3 = vector.load %arg3[%c0_3, %c0_4] : memref<256x128xf32, #tpu.memory_space<vmem>>, vector<256x128xf32>
    %cst_5 = arith.constant dense<0.000000e+00> : vector<128x128xf32>
    %4 = tpu.matmul %2, %3, %cst_5 {dimension_numbers = #tpu.dot_dimension_numbers<[1], [0], [0], [1], [0, 0, 1, 1], [], []>} : vector<128x256xf32>, vector<256x128xf32>, vector<128x128xf32> -> vector<128x128xf32>
    %c0_6 = arith.constant 0 : index
    %c0_7 = arith.constant 0 : index
    %5 = vector.load %arg4[%c0_6, %c0_7] : memref<128x128xf32, #tpu.memory_space<vmem>>, vector<128x128xf32>
    %cst_8 = arith.constant dense<0.000000e+00> : vector<128x128xf32>
    %6 = tpu.matmul %4, %5, %cst_8 {dimension_numbers = #tpu.dot_dimension_numbers<[1], [0], [0], [1], [0, 0, 1, 1], [], []>} : vector<128x128xf32>, vector<128x128xf32>, vector<128x128xf32> -> vector<128x128xf32>
    %c0_9 = arith.constant 0 : index
    %c0_10 = arith.constant 0 : index
    %7 = vector.load %arg5[%c0_9, %c0_10] : memref<128x128xf32, #tpu.memory_space<vmem>>, vector<128x128xf32>
    tpu.vector_store %arg5[%c0_9, %c0_10], %6 {strides = array<i32>} : memref<128x128xf32, #tpu.memory_space<vmem>>, vector<128x128xf32>,
    return
  }
  func.func @transform_0(%arg0: i32) -> (i32, i32) {
    %c0_i32 = arith.constant 0 : i32
    %c0_i32_0 = arith.constant 0 : i32
    return %arg0, %c0_i32 : i32, i32
  }
  func.func @transform_1(%arg0: i32) -> (i32, i32) {
    %c0_i32 = arith.constant 0 : i32
    %c0_i32_0 = arith.constant 0 : i32
    %c0_i32_1 = arith.constant 0 : i32
    return %c0_i32, %c0_i32_0 : i32, i32
  }
  func.func @transform_2(%arg0: i32) -> (i32, i32) {
    %c0_i32 = arith.constant 0 : i32
    %c0_i32_0 = arith.constant 0 : i32
    %c0_i32_1 = arith.constant 0 : i32
    return %c0_i32, %c0_i32_0 : i32, i32
  }
  func.func @transform_3(%arg0: i32) -> (i32, i32) {
    %c0_i32 = arith.constant 0 : i32
    %c0_i32_0 = arith.constant 0 : i32
    %c0_i32_1 = arith.constant 0 : i32
    return %c0_i32, %c0_i32_0 : i32, i32
  }
  func.func @transform_4(%arg0: i32) -> (i32, i32) {
    %c0_i32 = arith.constant 0 : i32
    %c0_i32_0 = arith.constant 0 : i32
    return %arg0, %c0_i32 : i32, i32
  }
}

</mosaic_0001>

<bundles_post_ra>
// kernel: tpu_custom_call.1
= control target key start
LH: loop header
LB: loop body
LE: loop exit
PB: predicated region body
PF: predicated region fallthrough
CT: control target
= control target key end

     0   :  { %9 = vsyncpa [#allocation3], 0  ;;  %s1416_s0 = inlined_call_operand.hbm [shape: f32[256,128], index: 0, kind: input, shape index: {}]   ;;  %s1417_s1 = inlined_call_operand.hbm [shape: f32[128,256], index: 1, kind: input, shape index: {}]   ;;  %s1418_s2 = inlined_call_operand.hbm [shape: f32[256,128], index: 2, kind: input, shape index: {}]   ;;  %s1419_s3 = inlined_call_operand.hbm [shape: f32[128,128], index: 3, kind: input, shape index: {}]   ;;  %s1420_s4 = inlined_call_operand.hbm [shape: f32[256,128], index: 4, kind: output, shape index: {}]  }
   0x1   :  { %11 = vsyncpa [#allocation3 + $0x1], 0 }
   0x2   :  { %12 = vsyncpa [#allocation6], 0 }
   0x3   :  { %13 = vsyncpa [#allocation9], 0 }
   0x4   :  { %14 = vsyncpa [#allocation4], 0 }
   0x5   :  { %16 = vsyncpa [#allocation4 + $0x1], 0  ;;  %s1208_s15 = smov 0   ;;  %s1210_s16 = smov 0  }
   0x6   :  { %s1212_s17 = smov 0   ;;  %s1214_s18 = smov 0  }
   0x7 LB: > { %s1229_s19 = sadd.s32 4294967295, %s1172_s18   ;;  %s825_s20 = sadd.s32 4294967294, %s1172_s18   ;;  %s1172_s18 = sphi %s1214_s18, %s1431_s18   ;;  %s1168_s17 = sphi %s1212_s17, %s1430_s17   ;;  %s1164_s16 = sphi %s1210_s16, %s1429_s16   ;;  %s1160_s15 = sphi %s1208_s15, %s1428_s15  }
   0x8   : > { %p42_p0 = scmp.ne.s32.totalorder %s1164_s16, %s1160_s15  ;;  %p43_p1 = scmp.eq.s32.totalorder %s1229_s19, 0 }
   0x9   : > { %p129_p2 = scmp.eq.s32.totalorder %s1229_s19, 1  ;;  %p135_p3 = scmp.eq.s32.totalorder %s825_s20, 1 }
   0xa   : > { %p1238_p4 = por %p43_p1, %p42_p0  ;;  %p826_p5 = scmp.ge.s32.totalorder %s1172_s18, 1 }
   0xb   : > { %p1243_p6 = por %p135_p3, %p42_p0  ;;  %p142_p7 = scmp.lt.s32.totalorder %s1172_s18, 3 }
   0xc   : > { %s153_s25 = sshll.u32 %s1417_s1, 4  ;;  %s1174_s27 = smov [#allocation5]   ;;  %s154_s25 = int_to_ptr.hbm [resolvable:$true] %s153_s25 }
   0xd   : > { %p1251_p8 = pnand %p826_p5, %p142_p7  ;;  %s155_s28 = sshll.u32 %s1174_s27, 4  ;;  %s156_s28 = int_to_ptr.vmem [resolvable:$true] %s155_s28 }
   0xe   : > { %s167_s6 = sshll.u32 %s1418_s2, 4  ;;  %s1175_s7 = smov 256   ;;  %s168_s6 = int_to_ptr.hbm [resolvable:$true] %s167_s6 }
   0xf   : > { %p911_p9 = pneg %p1251_p8  ;;  %s1176_s8 = smov 16  }
  0x10   : > { %s1177_s9 = smov [#allocation7]   ;;  %s1178_s11 = smov 128  }
  0x11   : > { %p1259_p10 = pnand %p911_p9, %p43_p1  ;;  %s169_s10 = sshll.u32 %s1177_s9, 4  ;;  %s170_s10 = int_to_ptr.vmem [resolvable:$true] %s169_s10 }
  0x12   : > { %s1179_s12 = smov 8   ;;  %s181_s20 = sshll.u32 %s1419_s3, 4  ;;  %s182_s20 = int_to_ptr.hbm [resolvable:$true] %s181_s20 }
  0x13   : > { %914 = dma.hbm_to_vmem [thread:$0]  (!%p1259_p10), %s154_s25, 4096, %s156_s28, [#allocation6], %s1175_s7, %s1175_s7, %s1176_s8  }
  0x14   : > { %917 = dma.hbm_to_vmem [thread:$0]  (!%p1259_p10), %s168_s6, 4096, %s170_s10, [#allocation6], %s1178_s11, %s1178_s11, %s1179_s12  }
  0x15   : > { %s1180_s23 = smov [#allocation8]   ;;  %s1283_s25 = sadd.s32 1, %s1172_s18  }
  0x16   : > { %s183_s24 = sshll.u32 %s1180_s23, 4  ;;  %s26_s27 = ssub.s32 %s1172_s18, %s1283_s25  ;;  %s184_s24 = int_to_ptr.vmem [resolvable:$true] %s183_s24 }
  0x17   : > { %920 = dma.hbm_to_vmem [thread:$0]  (!%p1259_p10), %s182_s20, 2048, %s184_s24, [#allocation9], %s1178_s11, %s1178_s11, %s1179_s12  }
  0x18   : > { %s29_s28 = sadd.s32 1, %s1168_s17  ;;  %p27_p12 = scmp.eq.s32.totalorder %s26_s27, 0 }
  0x19   : > { %p36_p13 = scmp.ne.s32.totalorder %s1168_s17, %s1164_s16  ;;  %p37_p0 = scmp.eq.s32.totalorder %s1172_s18, 0 }
  0x1a   : > { %s1292_s30 = scalar_select %p27_p12, %s1168_s17, %s29_s28  }
  0x1b   : > { %p1296_p3 = por %p129_p2, %p36_p13  ;;  %p932_p5 = scmp.lt.s32.totalorder %s1172_s18, 2 }
  0x1c   : > { %s197_s29 = sand.u32 1, %s1168_s17   ;;  %s845_s6 = sshll.u32 %s1172_s18, 7 }
  0x1d   : > { %p38_p7 = por %p37_p0, %p36_p13  ;;  %s831_s7 = sshll.u32 %s197_s29, 7 }
  0x1e   : > { %s206_s10 = scalar_lea.hbm %s1416_s0, %s845_s6  ;;  %s201_s14 = scalar_lea.vmem [#allocation2], %s831_s7 }
  0x1f   : > { %s207_s13 = sshll.u32 %s206_s10, 4  ;;  %s209_s20 = sshll.u32 %s201_s14, 4  ;;  %s208_s13 = int_to_ptr.hbm [resolvable:$true] %s207_s13  ;;  %s210_s20 = int_to_ptr.vmem [resolvable:$true] %s209_s20 }
  0x20   : > { %p1306_p9 = pnand %p932_p5, %p38_p7  ;;  %s198_s24 = scalar_lea.sflag [#allocation3], %s197_s29 }
  0x21   : > { %s1068_s27 = sshra.s32 %s208_s13, 4  ;;  %s1075_s7 = scalar_lea.hbm %s1416_s0, 256  ;;  %s1069_s27 = int_to_ptr.hbm [resolvable:$true] %s1068_s27 }
  0x22   : > { %s1070_s28 = scalar_lea.hbm %s1069_s27, 128  ;;  %p1072_p10 = pneg %p1306_p9 }
  0x23   : > { %p1071_p2 = scmp.ne.s32.totalorder %s1069_s27, %s1070_s28  ;;  %p1076_p0 = scmp.lt.s32.totalorder %s1069_s27, %s1416_s0 }
  0x24   : > { %p1077_p5 = scmp.lt.s32.totalorder %s1075_s7, %s1070_s28 }
  0x25   : > { %p1073_p12 = pnand %p1072_p10, %p1071_p2 }
  0x26   : > { %p1078_p7 = por %p1077_p5, %p1076_p0 }
  0x27   : > { %p1074_p13 = pneg %p1073_p12 }
  0x29   : > { %p1079_p11 = pnand %p1078_p7, %p1074_p13 }
  0x2b   : > { %1082 = shalt.err (!%p1079_p11)
}
  0x2c   : > { %924 = dma.hbm_to_vmem [thread:$0]  (!%p1306_p9), %s208_s13, 2048, %s210_s20, %s198_s24, %s1178_s11, %s1178_s11, %s1179_s12  }
  0x2d   : > { %221 = sbr.rel (%p1251_p8) target bundleno = 629 (0x275), region = 36  ;;  %s1326_s29 = sand.u32 (!%p1251_p8), 1, %s1164_s16  }
  0x2e   : > { %s835_s14 = sshll.u32 (!%p1251_p8), %s1326_s29, 7  ;;  %s224_s27 = scalar_lea.sflag (!%p1251_p8), [#allocation3], %s1326_s29 }
  0x2f   : > { %s1332_s28 = scalar_lea.vmem (!%p1251_p8), [#allocation2], %s835_s14 }
  0x32   : > { %1143 = dma.done.wait (%p1238_p4), %s224_s27, 2048  }
  0x33   : > { %1145 = vsyncadd (%p1238_p4), %s224_s27, 4294965248 }
  0x34   : > { %1147 = dma.done.wait (%p43_p1), [#allocation6], 8192  }
  0x35   : > { %1149 = vsyncadd (%p43_p1), [#allocation6], 4294959104 }
  0x36   : > { %1151 = dma.done.wait (%p43_p1), [#allocation9], 2048  }
  0x37   : > { %1153 = vsyncadd (%p43_p1), [#allocation9], 4294965248  ;;  %v316_v0 = vld [vmem:[#allocation5 + $0xf0] sm:$0xff]  ;;  %v314_v1 = vld [vmem:[#allocation5 + $0xe0] sm:$0xff]  ;;  %s1364_s21 = scalar_lea.vmem [#allocation10], %s835_s14  ;;  %s846_s26 = sshll.u32 %s1229_s19, 7 }
  0x38   : > { %318 = vmatpush.msra.mxu0 %v316_v0  ;;  %847 = vmatpush.msra.mxu1 %v316_v0  ;;  %v312_v2 = vld [vmem:[#allocation5 + $0xd0] sm:$0xff]  ;;  %v310_v3 = vld [vmem:[#allocation5 + $0xc0] sm:$0xff]  ;;  %v317_v18 = vld [vmem:[#allocation5 + $0xf8] sm:$0xff]  ;;  %s719_s13 = scalar_lea.hbm %s1420_s4, %s846_s26  ;;  %s720_s20 = sshll.u32 %s1364_s21, 4  ;;  %s721_s20 = int_to_ptr.vmem [resolvable:$true] %s720_s20 }
  0x39   : > { %848 = vmatpush.msra.mxu2 %v316_v0  ;;  %849 = vmatpush.msra.mxu3 %v316_v0  ;;  %v308_v4 = vld [vmem:[#allocation5 + $0xb0] sm:$0xff]  ;;  %v306_v5 = vld [vmem:[#allocation5 + $0xa0] sm:$0xff]  ;;  %v315_v19 = vld [vmem:[#allocation5 + $0xe8] sm:$0xff]  ;;  %s722_s23 = sshll.u32 %s719_s13, 4  ;;  %s708_s24 = scalar_lea.sflag [#allocation4], %s1326_s29  ;;  %s723_s23 = int_to_ptr.hbm [resolvable:$true] %s722_s23 }
  0x3a   : > { %319 = vmatpush.msra.mxu0 %v314_v1  ;;  %850 = vmatpush.msra.mxu1 %v314_v1  ;;  %v304_v6 = vld [vmem:[#allocation5 + $0x90] sm:$0xff]  ;;  %v302_v7 = vld [vmem:[#allocation5 + $0x80] sm:$0xff]  ;;  %v313_v20 = vld [vmem:[#allocation5 + $0xd8] sm:$0xff]  ;;  %s1112_s6 = sshra.s32 %s723_s23, 4  ;;  %s1118_s9 = scalar_lea.hbm %s1420_s4, 256  ;;  %s1113_s6 = int_to_ptr.hbm [resolvable:$true] %s1112_s6 }
  0x3b   : > { %851 = vmatpush.msra.mxu2 %v314_v1  ;;  %852 = vmatpush.msra.mxu3 %v314_v1  ;;  %v300_v8 = vld [vmem:[#allocation5 + $0x70] sm:$0xff]  ;;  %v298_v9 = vld [vmem:[#allocation5 + $0x60] sm:$0xff]  ;;  %v311_v21 = vld [vmem:[#allocation5 + $0xc8] sm:$0xff]  ;;  %s1114_s8 = scalar_lea.hbm %s1113_s6, 128  ;;  %p1119_p11 = scmp.lt.s32.totalorder %s1113_s6, %s1420_s4 }
  0x3c   : > { %320 = vmatpush.msra.mxu0 %v312_v2  ;;  %853 = vmatpush.msra.mxu1 %v312_v2  ;;  %v296_v10 = vld [vmem:[#allocation5 + $0x50] sm:$0xff]  ;;  %v294_v11 = vld [vmem:[#allocation5 + $0x40] sm:$0xff]  ;;  %v271_v22 = vld [vmem:[%s1332_s28 + $0x8] sm:$0xff]  ;;  %p1115_p1 = scmp.ne.s32.totalorder %s1113_s6, %s1114_s8  ;;  %p1120_p9 = scmp.lt.s32.totalorder %s1118_s9, %s1114_s8 }
  0x3d   : > { %854 = vmatpush.msra.mxu2 %v312_v2  ;;  %855 = vmatpush.msra.mxu3 %v312_v2  ;;  %v292_v12 = vld [vmem:[#allocation5 + $0x30] sm:$0xff]  ;;  %v290_v13 = vld [vmem:[#allocation5 + $0x20] sm:$0xff]  ;;  %v275_v23 = vld [vmem:[%s1332_s28 + $0x28] sm:$0xff] }
  0x3e   : > { %321 = vmatpush.msra.mxu0 %v310_v3  ;;  %856 = vmatpush.msra.mxu1 %v310_v3  ;;  %v288_v14 = vld [vmem:[#allocation5 + $0x10] sm:$0xff]  ;;  %v286_v15 = vld [vmem:[#allocation5] sm:$0xff]  ;;  %v309_v24 = vld [vmem:[#allocation5 + $0xb8] sm:$0xff]  ;;  %p1116_p4 = pnand %p1115_p1, %p1296_p3  ;;  %p1121_p2 = por %p1120_p9, %p1119_p11 }
  0x3f   : > { %857 = vmatpush.msra.mxu2 %v310_v3  ;;  %858 = vmatpush.msra.mxu3 %v310_v3  ;;  %v270_v16 = vld [vmem:[%s1332_s28] sm:$0xff]  ;;  %v307_v25 = vld [vmem:[#allocation5 + $0xa8] sm:$0xff]  ;;  %v305_v26 = vld [vmem:[#allocation5 + $0x98] sm:$0xff] }
  0x40   : > { %322 = vmatpush.msra.mxu0 %v308_v4  ;;  %859 = vmatpush.msra.mxu1 %v308_v4  ;;  %v274_v17 = vld [vmem:[%s1332_s28 + $0x20] sm:$0xff]  ;;  %v303_v27 = vld [vmem:[#allocation5 + $0x88] sm:$0xff]  ;;  %v272_v28 = vld [vmem:[%s1332_s28 + $0x10] sm:$0xff]  ;;  %p1117_p8 = pneg %p1116_p4 }
  0x41   : > { %860 = vmatpush.msra.mxu2 %v308_v4  ;;  %861 = vmatpush.msra.mxu3 %v308_v4  ;;  %v276_v29 = vld [vmem:[%s1332_s28 + $0x30] sm:$0xff]  ;;  %v301_v30 = vld [vmem:[#allocation5 + $0x78] sm:$0xff]  ;;  %v299_v31 = vld [vmem:[#allocation5 + $0x68] sm:$0xff] }
  0x42   : > { %323 = vmatpush.msra.mxu0 %v306_v5  ;;  %862 = vmatpush.msra.mxu1 %v306_v5  ;;  %v297_v32 = vld [vmem:[#allocation5 + $0x58] sm:$0xff]  ;;  %v295_v33 = vld [vmem:[#allocation5 + $0x48] sm:$0xff]  ;;  %v278_v40 = vld [vmem:[%s1332_s28 + $0x40] sm:$0xff]  ;;  %p1122_p10 = pnand %p1121_p2, %p1117_p8 }
  0x43   : > { %863 = vmatpush.msra.mxu2 %v306_v5  ;;  %864 = vmatpush.msra.mxu3 %v306_v5  ;;  %v273_v34 = vld [vmem:[%s1332_s28 + $0x18] sm:$0xff]  ;;  %v291_v37 = vld [vmem:[#allocation5 + $0x28] sm:$0xff]  ;;  %v462_v42 = vld [vmem:[#allocation7 + $0x70] sm:$0xff] }
  0x44   : > { %324 = vmatpush.msra.mxu0 %v304_v6  ;;  %865 = vmatpush.msra.mxu1 %v304_v6  ;;  %v277_v35 = vld [vmem:[%s1332_s28 + $0x38] sm:$0xff]  ;;  %v287_v39 = vld [vmem:[#allocation5 + $0x8] sm:$0xff]  ;;  %v460_v45 = vld [vmem:[#allocation7 + $0x60] sm:$0xff] }
  0x45   : > { %866 = vmatpush.msra.mxu2 %v304_v6  ;;  %867 = vmatpush.msra.mxu3 %v304_v6  ;;  %v293_v36 = vld [vmem:[#allocation5 + $0x38] sm:$0xff]  ;;  %v279_v43 = vld [vmem:[%s1332_s28 + $0x48] sm:$0xff]  ;;  %v458_v47 = vld [vmem:[#allocation7 + $0x50] sm:$0xff] }
  0x46   : > { %325 = vmatpush.msra.mxu0 %v302_v7  ;;  %868 = vmatpush.msra.mxu1 %v302_v7  ;;  %v289_v38 = vld [vmem:[#allocation5 + $0x18] sm:$0xff]  ;;  %v461_v44 = vld [vmem:[#allocation7 + $0x68] sm:$0xff]  ;;  %v280_v48 = vld [vmem:[%s1332_s28 + $0x50] sm:$0xff] }
  0x47   : > { %869 = vmatpush.msra.mxu2 %v302_v7  ;;  %870 = vmatpush.msra.mxu3 %v302_v7  ;;  %v463_v41 = vld [vmem:[#allocation7 + $0x78] sm:$0xff]  ;;  %v457_v49 = vld [vmem:[#allocation7 + $0x48] sm:$0xff]  ;;  %v456_v50 = vld [vmem:[#allocation7 + $0x40] sm:$0xff] }
  0x48   : > { %326 = vmatpush.msra.mxu0 %v300_v8  ;;  %871 = vmatpush.msra.mxu1 %v300_v8  ;;  %v459_v46 = vld [vmem:[#allocation7 + $0x58] sm:$0xff]  ;;  %v454_v52 = vld [vmem:[#allocation7 + $0x30] sm:$0xff]  ;;  %v453_v54 = vld [vmem:[#allocation7 + $0x28] sm:$0xff] }
  0x49   : > { %872 = vmatpush.msra.mxu2 %v300_v8  ;;  %873 = vmatpush.msra.mxu3 %v300_v8  ;;  %v455_v51 = vld [vmem:[#allocation7 + $0x38] sm:$0xff]  ;;  %v452_v55 = vld [vmem:[#allocation7 + $0x20] sm:$0xff]  ;;  %v450_v57 = vld [vmem:[#allocation7 + $0x10] sm:$0xff] }
  0x4a   : > { %327 = vmatpush.msra.mxu0 %v298_v9  ;;  %874 = vmatpush.msra.mxu1 %v298_v9  ;;  %v281_v53 = vld [vmem:[%s1332_s28 + $0x58] sm:$0xff]  ;;  %v282_v58 = vld [vmem:[%s1332_s28 + $0x60] sm:$0xff]  ;;  %v449_v59 = vld [vmem:[#allocation7 + $0x8] sm:$0xff] }
  0x4b   : > { %875 = vmatpush.msra.mxu2 %v298_v9  ;;  %876 = vmatpush.msra.mxu3 %v298_v9  ;;  %v451_v56 = vld [vmem:[#allocation7 + $0x18] sm:$0xff]  ;;  %v448_v60 = vld [vmem:[#allocation7] sm:$0xff]  ;;  %v478_v62 = vld [vmem:[#allocation7 + $0xf0] sm:$0xff] }
  0x4c   : > { %328 = vmatpush.msra.mxu0 %v296_v10  ;;  %877 = vmatpush.msra.mxu1 %v296_v10  ;;  %v479_v61 = vld [vmem:[#allocation7 + $0xf8] sm:$0xff]  ;;  %v283_v63 = vld [vmem:[%s1332_s28 + $0x68] sm:$0xff]  ;;  %v476_v1 = vld [vmem:[#allocation7 + $0xe0] sm:$0xff] }
  0x4d   : > { %878 = vmatpush.msra.mxu2 %v296_v10  ;;  %879 = vmatpush.msra.mxu3 %v296_v10  ;;  %v477_v0 = vld [vmem:[#allocation7 + $0xe8] sm:$0xff]  ;;  %v475_v2 = vld [vmem:[#allocation7 + $0xd8] sm:$0xff]  ;;  %v474_v3 = vld [vmem:[#allocation7 + $0xd0] sm:$0xff] }
  0x4e   : > { %329 = vmatpush.msra.mxu0 %v294_v11  ;;  %880 = vmatpush.msra.mxu1 %v294_v11  ;;  %v284_v4 = vld [vmem:[%s1332_s28 + $0x70] sm:$0xff]  ;;  %v473_v5 = vld [vmem:[#allocation7 + $0xc8] sm:$0xff]  ;;  %v472_v6 = vld [vmem:[#allocation7 + $0xc0] sm:$0xff] }
  0x4f   : > { %881 = vmatpush.msra.mxu2 %v294_v11  ;;  %882 = vmatpush.msra.mxu3 %v294_v11  ;;  %v471_v7 = vld [vmem:[#allocation7 + $0xb8] sm:$0xff]  ;;  %v470_v8 = vld [vmem:[#allocation7 + $0xb0] sm:$0xff]  ;;  %v469_v10 = vld [vmem:[#allocation7 + $0xa8] sm:$0xff] }
  0x50   : > { %330 = vmatpush.msra.mxu0 %v292_v12  ;;  %883 = vmatpush.msra.mxu1 %v292_v12  ;;  %v285_v9 = vld [vmem:[%s1332_s28 + $0x78] sm:$0xff]  ;;  %v468_v11 = vld [vmem:[#allocation7 + $0xa0] sm:$0xff] }
  0x51   : > { %884 = vmatpush.msra.mxu2 %v292_v12  ;;  %885 = vmatpush.msra.mxu3 %v292_v12  ;;  %v467_v12 = vld [vmem:[#allocation7 + $0x98] sm:$0xff] }
  0x52   : > { %331 = vmatpush.msra.mxu0 %v290_v13  ;;  %886 = vmatpush.msra.mxu1 %v290_v13 }
  0x53   : > { %887 = vmatpush.msra.mxu2 %v290_v13  ;;  %888 = vmatpush.msra.mxu3 %v290_v13  ;;  %v466_v13 = vld [vmem:[#allocation7 + $0x90] sm:$0xff] }
  0x54   : > { %332 = vmatpush.msra.mxu0 %v288_v14  ;;  %889 = vmatpush.msra.mxu1 %v288_v14 }
  0x55   : > { %890 = vmatpush.msra.mxu2 %v288_v14  ;;  %891 = vmatpush.msra.mxu3 %v288_v14  ;;  %v465_v14 = vld [vmem:[#allocation7 + $0x88] sm:$0xff] }
  0x56   : > { %333 = vmatpush.msra.mxu0 %v286_v15  ;;  %892 = vmatpush.msra.mxu1 %v286_v15 }
  0x57   : > { %334 = vmatmul.f32.vlgmr.msra.gmra.mxu0 %v270_v16  ;;  %346 = vmatmul.f32.vlgmr.msra.gmra.mxu1 %v274_v17 }
  0x58   : > { %383 = vmatpush.msrb.mxu1 %v317_v18  ;;  %893 = vmatpush.msra.mxu2 %v286_v15 }
  0x59   : > { %894 = vmatpush.msra.mxu3 %v286_v15  ;;  %358 = vmatmul.f32.vlgmr.msra.gmra.mxu2 %v278_v40  ;;  %v464_v15 = vld [vmem:[#allocation7 + $0x80] sm:$0xff] }
  0x5a   : > { %384 = vmatpush.msrb.mxu1 %v315_v19  ;;  %480 = vmatpush.msrb.mxu2 %v463_v41  ;;  %v624_v41 = vld [vmem:[#allocation8 + $0x70] sm:$0xff] }
  0x5b   : > { %370 = vmatmul.f32.vlgmr.msra.gmra.mxu3 %v282_v58 }
  0x5c   : > { %385 = vmatpush.msrb.mxu1 %v313_v20  ;;  %481 = vmatpush.msrb.mxu2 %v462_v42  ;;  %v623_v42 = vld [vmem:[#allocation8 + $0x68] sm:$0xff] }
  0x5d   : > { %545 = vmatpush.msrb.mxu3 %v479_v61 }
  0x5e   : > { %386 = vmatpush.msrb.mxu1 %v311_v21  ;;  %482 = vmatpush.msrb.mxu2 %v461_v44  ;;  %v621_v44 = vld [vmem:[#allocation8 + $0x58] sm:$0xff] }
  0x5f   : > { %337 = vmatmul.f32.gmra.mxu0 %v271_v22  ;;  %349 = vmatmul.f32.gmra.mxu1 %v275_v23 }
  0x60   : > { %387 = vmatpush.msrb.mxu1 %v309_v24  ;;  %483 = vmatpush.msrb.mxu2 %v460_v45 }
  0x61   : > { %361 = vmatmul.f32.gmra.mxu2 %v279_v43  ;;  %546 = vmatpush.msrb.mxu3 %v478_v62 }
  0x62   : > { %388 = vmatpush.msrb.mxu1 %v307_v25  ;;  %484 = vmatpush.msrb.mxu2 %v459_v46 }
  0x63   : > { %373 = vmatmul.f32.gmra.mxu3 %v283_v63 }
  0x64   : > { %389 = vmatpush.msrb.mxu1 %v305_v26  ;;  %485 = vmatpush.msrb.mxu2 %v458_v47  ;;  %v620_v47 = vld [vmem:[#allocation8 + $0x50] sm:$0xff] }
  0x65   : > { %547 = vmatpush.msrb.mxu3 %v477_v0 }
  0x66   : > { %390 = vmatpush.msrb.mxu1 %v303_v27  ;;  %486 = vmatpush.msrb.mxu2 %v457_v49  ;;  %v618_v49 = vld [vmem:[#allocation8 + $0x40] sm:$0xff] }
  0x67   : > { %340 = vmatmul.f32.gmra.mxu0 %v272_v28  ;;  %352 = vmatmul.f32.gmra.mxu1 %v276_v29 }
  0x68   : > { %391 = vmatpush.msrb.mxu1 %v301_v30  ;;  %487 = vmatpush.msrb.mxu2 %v456_v50  ;;  %v617_v50 = vld [vmem:[#allocation8 + $0x38] sm:$0xff] }
  0x69   : > { %364 = vmatmul.f32.gmra.mxu2 %v280_v48  ;;  %548 = vmatpush.msrb.mxu3 %v476_v1 }
  0x6a   : > { %392 = vmatpush.msrb.mxu1 %v299_v31  ;;  %488 = vmatpush.msrb.mxu2 %v455_v51 }
  0x6b   : > { %549 = vmatpush.msrb.mxu3 %v475_v2 }
  0x6c   : > { %393 = vmatpush.msrb.mxu1 %v297_v32  ;;  %489 = vmatpush.msrb.mxu2 %v454_v52 }
  0x6d   : > { %550 = vmatpush.msrb.mxu3 %v474_v3 }
  0x6e   : > { %394 = vmatpush.msrb.mxu1 %v295_v33  ;;  %490 = vmatpush.msrb.mxu2 %v453_v54  ;;  %v615_v54 = vld [vmem:[#allocation8 + $0x28] sm:$0xff] }
  0x6f   : > { %343 = vmatmul.f32.gmra.mxu0 %v273_v34  ;;  %355 = vmatmul.f32.gmra.mxu1 %v277_v35 }
  0x70   : > { %395 = vmatpush.msrb.mxu1 %v293_v36  ;;  %491 = vmatpush.msrb.mxu2 %v452_v55  ;;  %v614_v55 = vld [vmem:[#allocation8 + $0x20] sm:$0xff] }
  0x71   : > { %367 = vmatmul.f32.gmra.mxu2 %v281_v53  ;;  %376 = vmatmul.f32.gmra.mxu3 %v284_v4 }
  0x72   : > { %396 = vmatpush.msrb.mxu1 %v291_v37  ;;  %492 = vmatpush.msrb.mxu2 %v451_v56  ;;  %v613_v56 = vld [vmem:[#allocation8 + $0x18] sm:$0xff] }
  0x73   : > { %551 = vmatpush.msrb.mxu3 %v473_v5 }
  0x74   : > { %397 = vmatpush.msrb.mxu1 %v289_v38  ;;  %493 = vmatpush.msrb.mxu2 %v450_v57  ;;  %v625_v38 = vld [vmem:[#allocation8 + $0x78] sm:$0xff]  ;;  %v612_v57 = vld [vmem:[#allocation8 + $0x10] sm:$0xff] }
  0x75   : > { %552 = vmatpush.msrb.mxu3 %v472_v6  ;;  %626 = vmatpush.msrb.mxu0 %v625_v38 }
  0x76   : > { %398 = vmatpush.msrb.mxu1 %v287_v39  ;;  %494 = vmatpush.msrb.mxu2 %v449_v59  ;;  %v611_v59 = vld [vmem:[#allocation8 + $0x8] sm:$0xff] }
  0x77   : > { %399 = vmatmul.f32.vlgmr.msrb.gmra.mxu1 %v270_v16  ;;  %553 = vmatpush.msrb.mxu3 %v471_v7 }
  0x78   : > { %495 = vmatpush.msrb.mxu2 %v448_v60  ;;  %627 = vmatpush.msrb.mxu0 %v624_v41  ;;  %v610_v60 = vld [vmem:[#allocation8] sm:$0xff] }
  0x79   : > { %554 = vmatpush.msrb.mxu3 %v470_v8 }
  0x7a   : > { %379 = vmatmul.f32.gmra.mxu3 %v285_v9  ;;  %628 = vmatpush.msrb.mxu0 %v623_v42 }
  0x7b   : > { %555 = vmatpush.msrb.mxu3 %v469_v10 }
  0x7d   : > { %556 = vmatpush.msrb.mxu3 %v468_v11 }
  0x7f   : > { %402 = vmatmul.f32.gmra.mxu1 %v271_v22  ;;  %557 = vmatpush.msrb.mxu3 %v467_v12 }
  0x81   : > { %558 = vmatpush.msrb.mxu3 %v466_v13 }
  0x83   : > { %559 = vmatpush.msrb.mxu3 %v465_v14 }
  0x85   : > { %560 = vmatpush.msrb.mxu3 %v464_v15 }
  0x87   : > { %405 = vmatmul.f32.gmra.mxu1 %v272_v28 }
  0x8f   : > { %408 = vmatmul.f32.gmra.mxu1 %v273_v34 }
  0x97   : > { %411 = vmatmul.f32.gmra.mxu1 %v274_v17 }
  0x9f   : > { %414 = vmatmul.f32.gmra.mxu1 %v275_v23 }
  0xa7   : > { %417 = vmatmul.f32.gmra.mxu1 %v276_v29 }
  0xaf   : > { %420 = vmatmul.f32.gmra.mxu1 %v277_v35 }
  0xb7   : > { %423 = vmatmul.f32.gmra.mxu1 %v278_v40 }
  0xbf   : > { %426 = vmatmul.f32.gmra.mxu1 %v279_v43  ;;  %v622_v43 = vld [vmem:[#allocation8 + $0x60] sm:$0xff] }
  0xc0   : > { %629 = vmatpush.msrb.mxu0 %v622_v43 }
  0xc2   : > { %630 = vmatpush.msrb.mxu0 %v621_v44 }
  0xc4   : > { %631 = vmatpush.msrb.mxu0 %v620_v47 }
  0xc7   : > { %429 = vmatmul.f32.gmra.mxu1 %v280_v48  ;;  %v619_v48 = vld [vmem:[#allocation8 + $0x48] sm:$0xff] }
  0xc8   : > { %632 = vmatpush.msrb.mxu0 %v619_v48 }
  0xca   : > { %633 = vmatpush.msrb.mxu0 %v618_v49 }
  0xcc   : > { %634 = vmatpush.msrb.mxu0 %v617_v50 }
  0xcf   : > { %432 = vmatmul.f32.gmra.mxu1 %v281_v53  ;;  %v616_v53 = vld [vmem:[#allocation8 + $0x30] sm:$0xff] }
  0xd0   : > { %635 = vmatpush.msrb.mxu0 %v616_v53 }
  0xd2   : > { %636 = vmatpush.msrb.mxu0 %v615_v54 }
  0xd4   : > { %v335_v16 = vpop.f32.mrf.mxu0  ;;  %v347_v17 = vpop.f32.mrf.mxu1  ;;  %637 = vmatpush.msrb.mxu0 %v614_v55 }
  0xd5   : > { %496 = vmatmul.f32.vlgmr.msrb.gmra.mxu2 %v335_v16 }
  0xd6   : > { %638 = vmatpush.msrb.mxu0 %v613_v56 }
  0xd7   : > { %435 = vmatmul.f32.gmra.mxu1 %v282_v58 }
  0xd8   : > { %639 = vmatpush.msrb.mxu0 %v612_v57 }
  0xda   : > { %640 = vmatpush.msrb.mxu0 %v611_v59 }
  0xdc   : > { %v338_v18 = vpop.f32.mrf.mxu0  ;;  %v350_v19 = vpop.f32.mrf.mxu1  ;;  %641 = vmatpush.msrb.mxu0 %v610_v60 }
  0xdd   : > { %499 = vmatmul.f32.gmra.mxu2 %v338_v18  ;;  %v359_v28 = vpop.f32.mrf.mxu2 }
  0xde   : > { %v371_v36 = vpop.f32.mrf.mxu3 }
  0xdf   : > { %438 = vmatmul.f32.gmra.mxu1 %v283_v63 }
  0xe4   : > { %v341_v20 = vpop.f32.mrf.mxu0  ;;  %v353_v21 = vpop.f32.mrf.mxu1 }
  0xe5   : > { %502 = vmatmul.f32.gmra.mxu2 %v341_v20  ;;  %v362_v31 = vpop.f32.mrf.mxu2 }
  0xe6   : > { %v374_v40 = vpop.f32.mrf.mxu3 }
  0xe7   : > { %441 = vmatmul.f32.gmra.mxu1 %v284_v4 }
  0xec   : > { %v344_v22 = vpop.f32.mrf.mxu0  ;;  %v356_v23 = vpop.f32.mrf.mxu1 }
  0xed   : > { %505 = vmatmul.f32.gmra.mxu2 %v344_v22  ;;  %v365_v33 = vpop.f32.mrf.mxu2 }
  0xef   : > { %444 = vmatmul.f32.gmra.mxu1 %v285_v9 }
  0xf4   : > { %v400_v24 = vpop.f32.mrf.mxu1  ;;  %v377_v46 = vpop.f32.mrf.mxu3 }
  0xf5   : > { %508 = vmatmul.f32.gmra.mxu2 %v347_v17  ;;  %561 = vmatmul.f32.vlgmr.msrb.gmra.mxu3 %v400_v24  ;;  %v368_v35 = vpop.f32.mrf.mxu2 }
  0xfc   : > { %v403_v25 = vpop.f32.mrf.mxu1 }
  0xfd   : > { %511 = vmatmul.f32.gmra.mxu2 %v350_v19  ;;  %564 = vmatmul.f32.gmra.mxu3 %v403_v25  ;;  %v380_v52 = vpop.f32.mrf.mxu3 }
 0x104   : > { %v406_v26 = vpop.f32.mrf.mxu1 }
 0x105   : > { %514 = vmatmul.f32.gmra.mxu2 %v353_v21  ;;  %567 = vmatmul.f32.gmra.mxu3 %v406_v26 }
 0x10c   : > { %v409_v27 = vpop.f32.mrf.mxu1 }
 0x10d   : > { %517 = vmatmul.f32.gmra.mxu2 %v356_v23  ;;  %570 = vmatmul.f32.gmra.mxu3 %v409_v27 }
 0x114   : > { %v412_v29 = vpop.f32.mrf.mxu1 }
 0x115   : > { %573 = vmatmul.f32.gmra.mxu3 %v412_v29  ;;  %520 = vmatmul.f32.gmra.mxu2 %v359_v28 }
 0x11c   : > { %v415_v30 = vpop.f32.mrf.mxu1 }
 0x11d   : > { %576 = vmatmul.f32.gmra.mxu3 %v415_v30  ;;  %523 = vmatmul.f32.gmra.mxu2 %v362_v31 }
 0x124   : > { %v418_v32 = vpop.f32.mrf.mxu1 }
 0x125   : > { %579 = vmatmul.f32.gmra.mxu3 %v418_v32  ;;  %526 = vmatmul.f32.gmra.mxu2 %v365_v33 }
 0x12c   : > { %v421_v34 = vpop.f32.mrf.mxu1 }
 0x12d   : > { %582 = vmatmul.f32.gmra.mxu3 %v421_v34  ;;  %529 = vmatmul.f32.gmra.mxu2 %v368_v35 }
 0x134   : > { %v424_v37 = vpop.f32.mrf.mxu1 }
 0x135   : > { %585 = vmatmul.f32.gmra.mxu3 %v424_v37  ;;  %532 = vmatmul.f32.gmra.mxu2 %v371_v36 }
 0x13c   : > { %v427_v39 = vpop.f32.mrf.mxu1 }
 0x13d   : > { %588 = vmatmul.f32.gmra.mxu3 %v427_v39  ;;  %535 = vmatmul.f32.gmra.mxu2 %v374_v40 }
 0x144   : > { %v430_v45 = vpop.f32.mrf.mxu1 }
 0x145   : > { %591 = vmatmul.f32.gmra.mxu3 %v430_v45  ;;  %538 = vmatmul.f32.gmra.mxu2 %v377_v46 }
 0x14c   : > { %v433_v51 = vpop.f32.mrf.mxu1 }
 0x14d   : > { %594 = vmatmul.f32.gmra.mxu3 %v433_v51  ;;  %541 = vmatmul.f32.gmra.mxu2 %v380_v52 }
 0x154   : > { %v436_v58 = vpop.f32.mrf.mxu1 }
 0x155   : > { %597 = vmatmul.f32.gmra.mxu3 %v436_v58 }
 0x158   : > { %v497_v61 = vpop.f32.mrf.mxu2 }
 0x15c   : > { %v439_v62 = vpop.f32.mrf.mxu1 }
 0x15d   : > { %600 = vmatmul.f32.gmra.mxu3 %v439_v62 }
 0x160   : > { %v500_v63 = vpop.f32.mrf.mxu2 }
 0x164   : > { %v442_v0 = vpop.f32.mrf.mxu1 }
 0x165   : > { %603 = vmatmul.f32.gmra.mxu3 %v442_v0 }
 0x168   : > { %v503_v2 = vpop.f32.mrf.mxu2 }
 0x16c   : > { %v445_v1 = vpop.f32.mrf.mxu1 }
 0x16d   : > { %606 = vmatmul.f32.gmra.mxu3 %v445_v1 }
 0x170   : > { %v506_v3 = vpop.f32.mrf.mxu2 }
 0x178   : > { %v562_v4 = vpop.f32.mrf.mxu3  ;;  %v509_v8 = vpop.f32.mrf.mxu2 }
 0x179   : > { %v563_v5 = vadd.f32 %v562_v4, %v497_v61 }
 0x17b   : > { %642 = vmatmul.f32.vlgmr.msrb.gmra.mxu0 %v563_v5 }
 0x180   : > { %v565_v6 = vpop.f32.mrf.mxu3  ;;  %v512_v11 = vpop.f32.mrf.mxu2 }
 0x181   : > { %v566_v7 = vadd.f32 %v565_v6, %v500_v63 }
 0x183   : > { %645 = vmatmul.f32.gmra.mxu0 %v566_v7 }
 0x188   : > { %v568_v9 = vpop.f32.mrf.mxu3  ;;  %v515_v14 = vpop.f32.mrf.mxu2 }
 0x189   : > { %v569_v10 = vadd.f32 %v568_v9, %v503_v2 }
 0x18b   : > { %648 = vmatmul.f32.gmra.mxu0 %v569_v10 }
 0x190   : > { %v571_v12 = vpop.f32.mrf.mxu3  ;;  %v518_v17 = vpop.f32.mrf.mxu2 }
 0x191   : > { %v572_v13 = vadd.f32 %v571_v12, %v506_v3 }
 0x193   : > { %651 = vmatmul.f32.gmra.mxu0 %v572_v13 }
 0x198   : > { %v574_v15 = vpop.f32.mrf.mxu3  ;;  %v521_v21 = vpop.f32.mrf.mxu2 }
 0x199   : > { %v575_v16 = vadd.f32 %v574_v15, %v509_v8 }
 0x19b   : > { %654 = vmatmul.f32.gmra.mxu0 %v575_v16 }
 0x1a0   : > { %v577_v18 = vpop.f32.mrf.mxu3  ;;  %v524_v25 = vpop.f32.mrf.mxu2 }
 0x1a1   : > { %v578_v19 = vadd.f32 %v577_v18, %v512_v11 }
 0x1a3   : > { %657 = vmatmul.f32.gmra.mxu0 %v578_v19 }
 0x1a8   : > { %v580_v20 = vpop.f32.mrf.mxu3  ;;  %v527_v28 = vpop.f32.mrf.mxu2 }
 0x1a9   : > { %v581_v22 = vadd.f32 %v580_v20, %v515_v14 }
 0x1ab   : > { %660 = vmatmul.f32.gmra.mxu0 %v581_v22 }
 0x1b0   : > { %v583_v23 = vpop.f32.mrf.mxu3  ;;  %v530_v31 = vpop.f32.mrf.mxu2 }
 0x1b1   : > { %v584_v24 = vadd.f32 %v583_v23, %v518_v17 }
 0x1b3   : > { %663 = vmatmul.f32.gmra.mxu0 %v584_v24 }
 0x1b8   : > { %v586_v26 = vpop.f32.mrf.mxu3  ;;  %v533_v35 = vpop.f32.mrf.mxu2 }
 0x1b9   : > { %v587_v27 = vadd.f32 %v586_v26, %v521_v21 }
 0x1bb   : > { %666 = vmatmul.f32.gmra.mxu0 %v587_v27 }
 0x1c0   : > { %v589_v29 = vpop.f32.mrf.mxu3  ;;  %v536_v39 = vpop.f32.mrf.mxu2 }
 0x1c1   : > { %v590_v30 = vadd.f32 %v589_v29, %v524_v25 }
 0x1c3   : > { %669 = vmatmul.f32.gmra.mxu0 %v590_v30 }
 0x1c8   : > { %v592_v32 = vpop.f32.mrf.mxu3  ;;  %v539_v42 = vpop.f32.mrf.mxu2 }
 0x1c9   : > { %v593_v33 = vadd.f32 %v592_v32, %v527_v28 }
 0x1cb   : > { %672 = vmatmul.f32.gmra.mxu0 %v593_v33 }
 0x1d0   : > { %v595_v34 = vpop.f32.mrf.mxu3  ;;  %v542_v45 = vpop.f32.mrf.mxu2 }
 0x1d1   : > { %v596_v36 = vadd.f32 %v595_v34, %v530_v31 }
 0x1d3   : > { %675 = vmatmul.f32.gmra.mxu0 %v596_v36 }
 0x1d8   : > { %v598_v37 = vpop.f32.mrf.mxu3 }
 0x1d9   : > { %v599_v38 = vadd.f32 %v598_v37, %v533_v35 }
 0x1db   : > { %678 = vmatmul.f32.gmra.mxu0 %v599_v38 }
 0x1e0   : > { %v601_v40 = vpop.f32.mrf.mxu3 }
 0x1e1   : > { %v602_v41 = vadd.f32 %v601_v40, %v536_v39 }
 0x1e3   : > { %681 = vmatmul.f32.gmra.mxu0 %v602_v41 }
 0x1e8   : > { %v604_v43 = vpop.f32.mrf.mxu3 }
 0x1e9   : > { %v605_v44 = vadd.f32 %v604_v43, %v539_v42 }
 0x1eb   : > { %684 = vmatmul.f32.gmra.mxu0 %v605_v44 }
 0x1f0   : > { %v607_v46 = vpop.f32.mrf.mxu3 }
 0x1f1   : > { %v608_v47 = vadd.f32 %v607_v46, %v542_v45 }
 0x1f3   : > { %687 = vmatmul.f32.gmra.mxu0 %v608_v47 }
 0x1f8   : > { %v643_v48 = vpop.f32.mrf.mxu0 }
 0x1f9   : > { %691 = vst [vmem:[%s1364_s21] sm:$0xff] %v643_v48 }
 0x200   : > { %v646_v49 = vpop.f32.mrf.mxu0 }
 0x201   : > { %692 = vst [vmem:[%s1364_s21 + $0x8] sm:$0xff] %v646_v49 }
 0x208   : > { %v649_v50 = vpop.f32.mrf.mxu0 }
 0x209   : > { %693 = vst [vmem:[%s1364_s21 + $0x10] sm:$0xff] %v649_v50 }
 0x210   : > { %v652_v51 = vpop.f32.mrf.mxu0 }
 0x211   : > { %694 = vst [vmem:[%s1364_s21 + $0x18] sm:$0xff] %v652_v51 }
 0x218   : > { %v655_v52 = vpop.f32.mrf.mxu0 }
 0x219   : > { %695 = vst [vmem:[%s1364_s21 + $0x20] sm:$0xff] %v655_v52 }
 0x220   : > { %v658_v53 = vpop.f32.mrf.mxu0 }
 0x221   : > { %696 = vst [vmem:[%s1364_s21 + $0x28] sm:$0xff] %v658_v53 }
 0x228   : > { %v661_v54 = vpop.f32.mrf.mxu0 }
 0x229   : > { %697 = vst [vmem:[%s1364_s21 + $0x30] sm:$0xff] %v661_v54 }
 0x230   : > { %v664_v55 = vpop.f32.mrf.mxu0 }
 0x231   : > { %698 = vst [vmem:[%s1364_s21 + $0x38] sm:$0xff] %v664_v55 }
 0x238   : > { %v667_v56 = vpop.f32.mrf.mxu0 }
 0x239   : > { %699 = vst [vmem:[%s1364_s21 + $0x40] sm:$0xff] %v667_v56 }
 0x240   : > { %v670_v57 = vpop.f32.mrf.mxu0 }
 0x241   : > { %700 = vst [vmem:[%s1364_s21 + $0x48] sm:$0xff] %v670_v57 }
 0x248   : > { %v673_v58 = vpop.f32.mrf.mxu0 }
 0x249   : > { %701 = vst [vmem:[%s1364_s21 + $0x50] sm:$0xff] %v673_v58 }
 0x250   : > { %v676_v59 = vpop.f32.mrf.mxu0 }
 0x251   : > { %702 = vst [vmem:[%s1364_s21 + $0x58] sm:$0xff] %v676_v59 }
 0x258   : > { %v679_v60 = vpop.f32.mrf.mxu0 }
 0x259   : > { %703 = vst [vmem:[%s1364_s21 + $0x60] sm:$0xff] %v679_v60 }
 0x260   : > { %v682_v61 = vpop.f32.mrf.mxu0 }
 0x261   : > { %704 = vst [vmem:[%s1364_s21 + $0x68] sm:$0xff] %v682_v61 }
 0x268   : > { %v685_v62 = vpop.f32.mrf.mxu0 }
 0x269   : > { %705 = vst [vmem:[%s1364_s21 + $0x70] sm:$0xff] %v685_v62 }
 0x270   : > { %v688_v63 = vpop.f32.mrf.mxu0 }
 0x271   : > { %706 = vst [vmem:[%s1364_s21 + $0x78] sm:$0xff] %v688_v63 }
 0x272   : > { %1125 = shalt.err (!%p1122_p10)
}
 0x273   : > { %s1181_s29 = smov 128   ;;  %s1182_s27 = smov 8  }
 0x274   : > { %909 = dma.vmem_to_hbm [thread:$0]  (%p1296_p3), %s721_s20, 2048, %s723_s23, %s708_s24, %s1181_s29, %s1181_s29, %s1182_s27  }
 0x275 PF: > { %s737_s28 = sand.u32 1, %s1160_s15   ;;  %p1427_p12 = scmp.ge.s32.totalorder %s1172_s18, 2 }
 0x276   : > { %s738_s21 = scalar_lea.sflag [#allocation4], %s737_s28 }
 0x277   : > { %p926_p13 = pnand %p1427_p12, %p1243_p6 }
 0x279   : > { %p927_p0 = pneg %p926_p13 }
 0x27b   : > { %1155 = dma.done.wait (%p927_p0), %s738_s21, 2048  }
 0x27c   : > { %1157 = vsyncadd (%p927_p0), %s738_s21, 4294965248  ;;  %p19_p5 = scmp.ge.s32.totalorder %s1283_s25, 4   ;;  %s1428_s15 = smov %s1164_s16 }
 0x27d   : > { %s1429_s16 = smov %s1168_s17  ;;  %s1430_s17 = smov %s1292_s30 }
 0x27e   : > { %s1431_s18 = smov %s1283_s25  ;;  %21 = sbr.rel (!%p19_p5) target bundleno = 7 (0x7), region = 93 }
 0x283   :  { %744 = vsyncpa [#allocation3], 1 }
 0x284   :  { %746 = vsyncpa [#allocation3 + $0x1], 1 }
 0x285   :  { %747 = vsyncpa [#allocation6], 1 }
 0x286   :  { %748 = vsyncpa [#allocation9], 1 }
 0x287   :  { %749 = vsyncpa [#allocation4], 1 }
 0x288   :  { %751 = vsyncpa [#allocation4 + $0x1], 1 }

</bundles_post_ra>
